<compile_context>
chip_gen: v7x
topology: tpu7x:2x2x1
jax: 0.10.0
libtpu: 0.0.40
codegen_flags: <defaults>
</compile_context>

<pallas_src>
import jax
import jax.numpy as jnp
from jax.experimental import pallas as pl
from jax.experimental.pallas import tpu as pltpu


def _scale2_kernel(x_ref, y_ref):
    # Pure elementwise VPU work on the current VMEM tile.
    x = x_ref[...]
    y_ref[...] = x * jnp.asarray(2, dtype=x.dtype)


def _round_up(x, m):
    return ((x + m - 1) // m) * m


def _round_down(x, m):
    return (x // m) * m


def _sublane_pack(dtype) -> int:
    # Preferred second-to-last-dim multiple: 8 for 4-byte, 16 for 2-byte,
    # 32 for 1-byte dtypes (sub-32-bit types pack along sublanes).
    itemsize = jnp.dtype(dtype).itemsize
    return max(8, 32 // max(itemsize, 1))


def _largest_lane_dense_cols(total, col_cap):
    """Largest c with c % 128 == 0, total % c == 0, c <= col_cap.

    Assumes total % 128 == 0. Wider lane-dense rows mean fewer, larger
    contiguous DMA descriptors and denser unmasked stores.
    """
    m = total // 128
    cap_units = max(1, col_cap // 128)
    best = 1
    d = 1
    while d * d <= m:
        if m % d == 0:
            for cand in (d, m // d):
                if cand <= cap_units and cand > best:
                    best = cand
        d += 1
    return 128 * best


def _default_vmem_budget_bytes():
    # Total live pipeline-buffer budget (2x input + 2x output double-buffers).
    # ~24 MiB keeps per-tile sizes in the multi-MiB range (amortizing the
    # ~0.35us fixed grid-step overhead -- which matters most on 3.2 TB/s v7x
    # HBM) while staying well inside v7x's 64 MiB per-TC physical VMEM.
    budget = 24 * 1024 * 1024
    try:  # generation-aware clamp when the query is available
        cap = pltpu.get_tpu_info().vmem_capacity_bytes
        budget = min(budget, max(8 * 1024 * 1024, (cap * 3) // 8))
    except Exception:
        pass
    return budget


def foo_forward(x, *, vmem_budget_bytes=None):
    """Forward of Foo: returns (x, 2 * x).

    Only 2*x goes through the Pallas kernel; the first tuple element is the
    original array (no on-chip identity copy).
    """
    orig_shape = x.shape
    total = x.size
    dtype_bytes = jnp.dtype(x.dtype).itemsize
    pack = _sublane_pack(x.dtype)

    if vmem_budget_bytes is None:
        vmem_budget_bytes = _default_vmem_budget_bytes()
    # 1 input + 1 output, each double-buffered => ~4 live tiles.
    max_tile_bytes = max(vmem_budget_bytes // 4, pack * 128 * dtype_bytes)
    col_cap = max(128, _round_down(max_tile_bytes // (pack * dtype_bytes), 128))

    # ---- Choose a lane-dense 2-D view (pad if necessary). -------------------
    pad = 0
    if x.ndim >= 2 and x.shape[-1] % 128 == 0:
        cols = x.shape[-1]
        rows = total // cols
        x2 = x.reshape(rows, cols)
    elif total % 128 == 0:
        cols = _largest_lane_dense_cols(total, col_cap)
        rows = total // cols
        x2 = x.reshape(rows, cols)
    else:
        # Pad the flat array up to a multiple of 1024 (8 sublanes x 128 lanes)
        # so every tile is lane-dense with unmasked stores; slice pad off after.
        padded = _round_up(total, 1024)
        pad = padded - total
        flat = jnp.pad(x.reshape(-1), (0, pad))
        cols = _largest_lane_dense_cols(padded, col_cap)
        rows = padded // cols
        x2 = flat.reshape(rows, cols)

    work = rows * cols

    # ---- Budget-driven tile shape. ------------------------------------------
    tile_cols = min(cols, col_cap) if cols % 128 == 0 else cols
    tile_rows = max_tile_bytes // max(tile_cols * dtype_bytes, 1)
    tile_rows = max(pack, _round_down(tile_rows, pack))
    tile_rows = min(tile_rows, rows)

    # Guarantee >= 2 grid blocks whenever the array is splittable so the
    # "parallel" grid axes can shard the stream across both TensorCores on
    # v7x (no-op on single-TC v5e/v6e).
    if pl.cdiv(rows, tile_rows) * pl.cdiv(cols, tile_cols) < 2:
        if rows >= 2 * pack:
            tile_rows = max(pack, _round_down(pl.cdiv(rows, 2), pack))
        elif cols % 128 == 0 and cols >= 2 * 128:
            tile_cols = max(128, _round_down(pl.cdiv(cols, 2), 128))
        # else: array too small to split; a single block is fine.

    grid = (pl.cdiv(rows, tile_rows), pl.cdiv(cols, tile_cols))
    spec = pl.BlockSpec((tile_rows, tile_cols), lambda i, j: (i, j))

    # Explicit VMEM headroom so the budget is not silently clipped to the
    # per-generation scoped default; stays <= 48 MiB (safe on v7x's 64 MiB).
    live_bytes = 4 * tile_rows * tile_cols * dtype_bytes
    vmem_limit = int(min(max(live_bytes + (8 << 20), 16 << 20), 48 << 20))

    y2 = pl.pallas_call(
        _scale2_kernel,
        out_shape=jax.ShapeDtypeStruct((rows, cols), x.dtype),
        grid=grid,
        in_specs=[spec],
        out_specs=spec,
        compiler_params=pltpu.CompilerParams(
            dimension_semantics=("parallel", "parallel"),
            vmem_limit_bytes=vmem_limit,
        ),
        cost_estimate=pl.CostEstimate(
            flops=work,
            transcendentals=0,
            bytes_accessed=2 * work * dtype_bytes,
        ),
    )(x2)

    if pad:
        y = y2.reshape(-1)[:total].reshape(orig_shape)
    else:
        y = y2.reshape(orig_shape)
    return x, y


if __name__ == "__main__":
    key = jax.random.PRNGKey(0)
    # Small tensor consistent with the module's generic forward (any shape).
    x = jax.random.normal(key, (2, 4, 16, 16), dtype=jnp.float32)

    x_out, y_out = foo_forward(x)
    jax.block_until_ready((x_out, y_out))

    assert x_out.shape == x.shape and y_out.shape == x.shape
    assert jnp.array_equal(x_out, x)
    assert jnp.allclose(y_out, 2.0 * x)

    # Also exercise the padded (non-multiple-of-128) path.
    x_odd = jax.random.normal(jax.random.PRNGKey(0), (3, 5, 7), dtype=jnp.float32)
    x_o, y_o = foo_forward(x_odd)
    jax.block_until_ready((x_o, y_o))
    assert y_o.shape == x_odd.shape
    assert jnp.allclose(y_o, 2.0 * x_odd)

    print("KERNEL_OK")
</pallas_src>

<mosaic_0001>
module attributes {stable_mosaic.version = 11 : i64} {
  func.func @_scale2_kernel(%arg0: i32, %arg1: i32, %arg2: memref<1x1024xf32, #tpu.memory_space<vmem>>, %arg3: memref<1x1024xf32, #tpu.memory_space<vmem>>) attributes {dimension_semantics = [#tpu.dimension_semantics<parallel>, #tpu.dimension_semantics<parallel>], iteration_bounds = array<i64: 1, 2>, scalar_prefetch = 0 : i64, scratch_operands = 0 : i64, tpu.core_type = #tpu.core_type<tc>, window_params = [{transform_indices = @transform_0, window_bounds = array<i64: 1, 1024>}, {transform_indices = @transform_1, window_bounds = array<i64: 1, 1024>}]} {
    %c0 = arith.constant 0 : index
    %c0_0 = arith.constant 0 : index
    %0 = vector.load %arg2[%c0, %c0_0] : memref<1x1024xf32, #tpu.memory_space<vmem>>, vector<1x1024xf32>
    %cst = arith.constant 2.000000e+00 : f32
    %1 = vector.broadcast %cst : f32 to vector<1x1024xf32>
    %2 = arith.mulf %0, %1 : vector<1x1024xf32>
    %c0_1 = arith.constant 0 : index
    %c0_2 = arith.constant 0 : index
    %3 = vector.load %arg3[%c0_1, %c0_2] : memref<1x1024xf32, #tpu.memory_space<vmem>>, vector<1x1024xf32>
    tpu.vector_store %arg3[%c0_1, %c0_2], %2 {strides = array<i32>} : memref<1x1024xf32, #tpu.memory_space<vmem>>, vector<1x1024xf32>,
    return
  }
  func.func @transform_0(%arg0: i32, %arg1: i32) -> (i32, i32) {
    %c0_i32 = arith.constant 0 : i32
    return %arg0, %arg1 : i32, i32
  }
  func.func @transform_1(%arg0: i32, %arg1: i32) -> (i32, i32) {
    %c0_i32 = arith.constant 0 : i32
    return %arg0, %arg1 : i32, i32
  }
}

</mosaic_0001>

<bundles_post_ra>
// kernel: tpu_custom_call.1
= control target key start
LH: loop header
LB: loop body
LE: loop exit
PB: predicated region body
PF: predicated region fallthrough
CT: control target
= control target key end

     0   :  { %6 = vsyncpa [#allocation3], 0  ;;  %s634_s0 = inlined_call_operand.hbm [shape: f32[1,2048], index: 0, kind: input, shape index: {}]   ;;  %s635_s1 = inlined_call_operand.hbm [shape: f32[1,2048], index: 1, kind: output, shape index: {}]  }
   0x1   :  { %8 = vsyncpa [#allocation3 + $0x1], 0 }
   0x2   :  { %9 = vsyncpa [#allocation4], 0 }
   0x3   :  { %11 = vsyncpa [#allocation4 + $0x1], 0  ;;  %s462_s6 = smov 0   ;;  %s464_s7 = smov 0  }
   0x4   :  { %s466_s8 = smov 0   ;;  %s468_s9 = smov 0  }
   0x5   :  { %s470_s10 = smov 0   ;;  %s472_s11 = smov 0  }
   0x6 LB: > { %s257_s12 = sadd.s32 4294967295, %s448_s11   ;;  %s258_s13 = sadd.s32 4294967294, %s448_s11   ;;  %s448_s11 = sphi %s472_s11, %s17_s11   ;;  %s444_s10 = sphi %s470_s10, %s651_s10   ;;  %s440_s9 = sphi %s468_s9, %s650_s9   ;;  %s436_s8 = sphi %s466_s8, %s649_s8   ;;  %s432_s7 = sphi %s464_s7, %s648_s7   ;;  %s428_s6 = sphi %s462_s6, %s647_s6  }
   0x7   : > { %s26_s14 = sadd.s32 1, %s444_s10  ;;  %s38_s15 = sadd.s32 1, %s436_s8 }
   0x8   : > { %p27_p0 = scmp.ge.s32.totalorder %s26_s14, 2  ;;  %p45_p1 = scmp.ne.s32.totalorder %s436_s8, %s432_s7 }
   0x9   : > { %p46_p2 = scmp.eq.s32.totalorder %s448_s11, 0  ;;  %p51_p3 = scmp.ne.s32.totalorder %s432_s7, %s428_s6 }
   0xa   : > { %s653_s14 = smov (%p27_p0, %s26_s14), 0  ;;  %p52_p5 = scmp.eq.s32.totalorder %s257_s12, 0 }
   0xb   : > { %p503_p4 = por %p46_p2, %p45_p1  ;;  %s34_s17 = ssub.s32 %s444_s10, %s653_s14 }
   0xc   : > { %p77_p6 = scmp.eq.s32.totalorder %s257_s12, 1  ;;  %p36_p7 = scmp.eq.s32.totalorder %s34_s17, 0 }
   0xd   : > { %p509_p8 = por %p52_p5, %p51_p3  ;;  %p83_p10 = scmp.eq.s32.totalorder %s258_s13, 1 }
   0xe   : > { %p513_p9 = por %p77_p6, %p45_p1  ;;  %p286_p13 = scmp.lt.s32.totalorder %s448_s11, 2 }
   0xf   : > { %s518_s20 = scalar_select %p36_p7, %s436_s8, %s38_s15  }
  0x10   : > { %s639_s19 = scalar_select %p513_p9, 1, 0 }
  0x11   : > { %p520_p11 = por %p83_p10, %p51_p3  ;;  %s103_s22 = sand.u32 1, %s436_s8  }
  0x12   : > { %s261_s23 = sshll.u32 %s103_s22, 3  ;;  %s272_s24 = sshll.u32 %s444_s10, 7 }
  0x13   : > { %s640_s21 = scalar_select %p520_p11, 1, 0 }
  0x14   : > { %s531_s27 = scalar_lea.hbm %s634_s0, %s272_s24  ;;  %s107_s28 = scalar_lea.vmem [#allocation2], %s261_s23 }
  0x15   : > { %s117_s29 = sshll.u32 %s107_s28, 4  ;;  %p537_p0 = pnand %p286_p13, %p503_p4  ;;  %s533_s29 = int_to_ptr.vmem [resolvable:$true] %s117_s29 }
  0x16   : > { %s104_s2 = scalar_lea.sflag [#allocation3], %s103_s22  ;;  %s336_s3 = scalar_lea.hbm %s531_s27, 128 }
  0x17   : > { %p337_p3 = scmp.ne.s32.totalorder %s531_s27, %s336_s3  ;;  %p338_p5 = pneg %p537_p0 }
  0x18   : > { %s341_s12 = scalar_lea.hbm %s634_s0, 256  ;;  %p342_p4 = scmp.lt.u32.totalorder %s531_s27, %s634_s0 }
  0x19   : > { %p339_p6 = pnand %p338_p5, %p337_p3  ;;  %p343_p10 = scmp.lt.u32.totalorder %s341_s12, %s336_s3 }
  0x1a   : > { %p345_p12 = scmp.lt.u32.totalorder %s336_s3, %s531_s27 }
  0x1b   : > { %p340_p7 = pneg %p339_p6  ;;  %p344_p13 = por %p343_p10, %p342_p4 }
  0x1d   : > { %p346_p1 = por %p345_p12, %p344_p13 }
  0x1f   : > { %p347_p2 = pnand %p346_p1, %p340_p7 }
  0x21   : > { %350 = shalt.err (!%p347_p2)
}
  0x22   : > { %s351_s16 = scalar_lea.vmem %s533_s29, 128  ;;  %s450_s17 = smov [#allocation2]  }
  0x23   : > { %p352_p3 = scmp.ne.s32.totalorder %s533_s29, %s351_s16  ;;  %s356_s22 = sshll.u32 %s450_s17, 4  ;;  %s357_s22 = int_to_ptr.vmem [resolvable:$false] %s356_s22 }
  0x24   : > { %s358_s23 = scalar_lea.vmem %s357_s22, 256  ;;  %p359_p9 = scmp.lt.s32.totalorder %s533_s29, %s357_s22 }
  0x25   : > { %p354_p6 = pnand %p352_p3, %p338_p5  ;;  %p360_p4 = scmp.lt.s32.totalorder %s358_s23, %s351_s16 }
  0x27   : > { %p355_p11 = pneg %p354_p6  ;;  %p361_p10 = por %p360_p4, %p359_p9 }
  0x29   : > { %p362_p12 = pnand %p361_p10, %p355_p11 }
  0x2b   : > { %365 = shalt.err (!%p362_p12)
}
  0x2c   : > { %281 = dma.hbm_to_vmem [thread:$0]  (!%p537_p0), %s531_s27, 128, %s533_s29, %s104_s2  }
  0x2d   : > { %p642_p1 = scmp.lt.s32.totalorder %s448_s11, 3  ;;  %p643_p2 = scmp.ge.s32.totalorder %s448_s11, 1 }
  0x2f   : > { %p123_p5 = pnand %p643_p2, %p642_p1 }
  0x30   : > { %s573_s24 = sand.u32 (!%p123_p5), 1, %s432_s7  }
  0x31   : > { %126 = sbr.rel (%p123_p5) target bundleno = 83 (0x53), region = 24  ;;  %s265_s25 = sshll.u32 (!%p123_p5), %s573_s24, 3 }
  0x32   : > { %s129_s26 = scalar_lea.sflag (!%p123_p5), [#allocation3], %s573_s24  ;;  %s132_s28 = scalar_lea.vmem (!%p123_p5), [#allocation2], %s265_s25 }
  0x38   : > { %419 = dma.done.wait (%p509_p8), %s129_s26, 128  }
  0x39   : > { %421 = vsyncadd (%p509_p8), %s129_s26, 4294967168  ;;  %s150_s27 = scalar_lea.vmem [#allocation5], %s265_s25  ;;  %s273_s30 = sshll.u32 %s440_s9, 7  ;;  %v153_v0 = vld [vmem:[%s132_s28] sm:$0xff] }
  0x3a   : > { %s173_s29 = sshll.u32 %s150_s27, 4  ;;  %v154_v1 = vmul.f32 2.0, %v153_v0  ;;  %s587_s4 = scalar_lea.hbm %s635_s1, %s273_s30  ;;  %s582_s29 = int_to_ptr.vmem [resolvable:$true] %s173_s29 }
  0x3b   : > { %s157_s18 = scalar_lea.sflag [#allocation4], %s573_s24  ;;  %s366_s5 = scalar_lea.vmem %s582_s29, 128 }
  0x3c   : > { %155 = vst [vmem:[%s150_s27] sm:$0xff] %v154_v1  ;;  %p367_p8 = scmp.ne.s32.totalorder %s582_s29, %s366_s5  ;;  %p644_p9 = scmp.ne.s32.totalorder %s639_s19, 0 }
  0x3d   : > { %s451_s9 = smov [#allocation5]  }
  0x3e   : > { %p368_p11 = pnand %p367_p8, %p644_p9  ;;  %s370_s12 = sshll.u32 %s451_s9, 4  ;;  %s371_s12 = int_to_ptr.vmem [resolvable:$false] %s370_s12 }
  0x3f   : > { %s372_s13 = scalar_lea.vmem %s371_s12, 256  ;;  %p373_p7 = scmp.lt.s32.totalorder %s582_s29, %s371_s12 }
  0x40   : > { %p369_p0 = pneg %p368_p11  ;;  %p374_p13 = scmp.lt.s32.totalorder %s372_s13, %s366_s5 }
  0x42   : > { %p375_p3 = por %p374_p13, %p373_p7 }
  0x44   : > { %p376_p6 = pnand %p375_p3, %p369_p0 }
  0x46   : > { %379 = shalt.err (!%p376_p6)
}
  0x47   : > { %s380_s15 = scalar_lea.hbm %s587_s4, 128  ;;  %s384_s22 = scalar_lea.hbm %s635_s1, 256 }
  0x48   : > { %p381_p4 = scmp.ne.s32.totalorder %s587_s4, %s380_s15  ;;  %p385_p1 = scmp.lt.u32.totalorder %s587_s4, %s635_s1 }
  0x49   : > { %p386_p2 = scmp.lt.u32.totalorder %s384_s22, %s380_s15  ;;  %p388_p8 = scmp.lt.u32.totalorder %s380_s15, %s587_s4 }
  0x4a   : > { %p382_p10 = pnand %p381_p4, %p644_p9 }
  0x4b   : > { %p387_p5 = por %p386_p2, %p385_p1 }
  0x4c   : > { %p383_p12 = pneg %p382_p10 }
  0x4d   : > { %p389_p11 = por %p388_p8, %p387_p5 }
  0x4f   : > { %p390_p0 = pnand %p389_p11, %p383_p12 }
  0x51   : > { %393 = shalt.err (!%p390_p0)
}
  0x52   : > { %276 = dma.vmem_to_hbm [thread:$0]  (%p644_p9), %s582_s29, 128, %s587_s4, %s157_s18  }
  0x53 PF: > { %s185_s25 = sand.u32 1, %s428_s6   ;;  %p645_p7 = scmp.ne.s32.totalorder %s640_s21, 0 }
  0x54   : > { %p646_p13 = scmp.ge.s32.totalorder %s448_s11, 2  ;;  %s186_s26 = scalar_lea.sflag [#allocation4], %s185_s25 }
  0x56   : > { %p283_p3 = pnand %p646_p13, %p645_p7 }
  0x58   : > { %423 = dma.done.wait (!%p283_p3), %s186_s26, 128  }
  0x59   : > { %425 = vsyncadd (!%p283_p3), %s186_s26, 4294967168  ;;  %s17_s11 = sadd.s32 1, %s448_s11   ;;  %s647_s6 = smov %s432_s7 }
  0x5a   : > { %p14_p6 = scmp.ge.s32.totalorder %s17_s11, 4   ;;  %s648_s7 = smov %s436_s8 }
  0x5b   : > { %s649_s8 = smov %s518_s20  ;;  %s650_s9 = smov %s444_s10 }
  0x5c   : > { %s651_s10 = smov %s653_s14  ;;  %16 = sbr.rel (!%p14_p6) target bundleno = 6 (0x6), region = 69 }
  0x63   :  { %191 = vsyncpa [#allocation3], 1 }
  0x64   :  { %193 = vsyncpa [#allocation3 + $0x1], 1 }
  0x65   :  { %194 = vsyncpa [#allocation4], 1 }
  0x66   :  { %196 = vsyncpa [#allocation4 + $0x1], 1 }

</bundles_post_ra>
